<compile_context>
chip_gen: v7x
topology: tpu7x:2x2x1
jax: 0.10.0
libtpu: 0.0.40
codegen_flags: <defaults>
</compile_context>

<pallas_src>
import jax
import jax.numpy as jnp
from jax.experimental import pallas as pl
from jax.experimental.pallas import tpu as pltpu

STATE_SPACE = 4
ACTION_SPACE = 2
HIDDEN = 64
HIDDEN_PAD = 128          # lane-dense hidden width
DROPOUT_P = 0.6


def actor_kernel(x_ref, u_ref, w1_ref, b1_ref, mask_ref, w2_ref, b2_ref,
                 action_ref, logprob_ref):
    # ---- Layer 1 on the VPU: h = b1 + sum_k x[k] * w1[k, :]   -> (1, 128)
    h = b1_ref[...]
    for k in range(x_ref.shape[0]):                  # static, unrolled (4)
        h = h + x_ref[k] * w1_ref[pl.ds(k, 1), :]

    # ---- Dropout (mask pre-scaled by 1/(1-p)), then ReLU (PyTorch order).
    h = h * mask_ref[...]
    h = jnp.maximum(h, 0.0)

    # ---- Layer 2 as VPU multiply + lane reduction:
    #      logits[a] = sum_j h[j] * w2[a, j] + b2[a]            -> (2, 1)
    logits = jnp.sum(h * w2_ref[...], axis=-1, keepdims=True) + b2_ref[...]

    # ---- Softmax / log-softmax over the 2 actions.
    m = jnp.max(logits, axis=0, keepdims=True)       # (1, 1)
    e = jnp.exp(logits - m)                          # (2, 1)
    z = jnp.sum(e, axis=0, keepdims=True)            # (1, 1)
    probs = e / z                                    # (2, 1)
    logp = (logits - m) - jnp.log(z)                 # (2, 1)

    # ---- Categorical sample via inverse CDF with the host-supplied uniform.
    row0f = (jax.lax.broadcasted_iota(jnp.int32, (ACTION_SPACE, 1), 0)
             == 0).astype(jnp.float32)
    p0 = jnp.sum(probs * row0f)                      # scalar P(action == 0)
    lp0 = jnp.sum(logp * row0f)                      # scalar log P(0)
    lp1 = jnp.sum(logp * (1.0 - row0f))              # scalar log P(1)

    take0 = u_ref[0] < p0
    action_ref[0] = jnp.where(take0, 0, 1).astype(jnp.int32)
    logprob_ref[0] = jnp.where(take0, lp0, lp1)


def actor_forward(x, u, params, dropout_mask):
    """Fused Actor forward for one state.

    x: (state_space,) f32.  u: (1,) f32 uniform for the categorical draw.
    dropout_mask: (1, hidden) f32, already scaled by 1/(1-p) (training mode).
    Returns (action int32 (1,), log_prob f32 (1,)).
    """
    w1, b1, w2, b2 = params
    state_space, hidden = w1.shape
    action_space = w2.shape[0]
    assert action_space == ACTION_SPACE  # in-kernel sampler is a 2-way select

    # Pad hidden dim to 128 lanes (zero pad -> padded lanes contribute 0).
    w1p = jnp.zeros((state_space, HIDDEN_PAD), jnp.float32).at[:, :hidden].set(w1)
    b1p = jnp.zeros((1, HIDDEN_PAD), jnp.float32).at[:, :hidden].set(b1)
    mkp = jnp.zeros((1, HIDDEN_PAD), jnp.float32).at[:, :hidden].set(dropout_mask)
    w2p = jnp.zeros((action_space, HIDDEN_PAD), jnp.float32).at[:, :hidden].set(w2)
    b2c = b2.reshape(action_space, 1).astype(jnp.float32)

    smem = pl.BlockSpec(memory_space=pltpu.MemorySpace.SMEM)
    vmem = pl.BlockSpec(memory_space=pltpu.MemorySpace.VMEM)

    action, logprob = pl.pallas_call(
        actor_kernel,
        out_shape=(jax.ShapeDtypeStruct((1,), jnp.int32),
                   jax.ShapeDtypeStruct((1,), jnp.float32)),
        in_specs=[smem, smem, vmem, vmem, vmem, vmem, vmem],
        out_specs=(smem, smem),
    )(x, u, w1p, b1p, mkp, w2p, b2c)
    return action, logprob


if __name__ == "__main__":
    key = jax.random.PRNGKey(0)
    kx, kw1, kb1, kw2, kb2, kd, ku = jax.random.split(key, 7)

    # gym state: 1-D float vector; forward() does unsqueeze(0) -> batch of 1.
    x = jax.random.normal(kx, (STATE_SPACE,), dtype=jnp.float32)

    def uinit(k, shape, fan_in):
        bound = 1.0 / float(fan_in) ** 0.5
        return jax.random.uniform(k, shape, jnp.float32, -bound, bound)

    # Weights stored so that x @ w1 == x @ W1_pt.T ; w2 kept in PyTorch
    # (out_features, in_features) layout and used row-wise in the kernel.
    w1 = uinit(kw1, (STATE_SPACE, HIDDEN), STATE_SPACE)
    b1 = uinit(kb1, (HIDDEN,), STATE_SPACE)
    w2 = uinit(kw2, (ACTION_SPACE, HIDDEN), HIDDEN)
    b2 = uinit(kb2, (ACTION_SPACE,), HIDDEN)

    # Training-mode dropout keep-mask, pre-scaled by 1/(1-p).
    keep = jax.random.bernoulli(kd, 1.0 - DROPOUT_P, (1, HIDDEN)).astype(jnp.float32)
    mask = keep / (1.0 - DROPOUT_P)

    # Uniform draw for the categorical sample (RNG stays outside the kernel).
    u = jax.random.uniform(ku, (1,), dtype=jnp.float32)

    action, logprob = actor_forward(x, u, (w1, b1, w2, b2), mask)
    action = jax.block_until_ready(action)
    logprob = jax.block_until_ready(logprob)

    # Pure-JAX reference (same mask, same uniform, same inverse-CDF sampler).
    h = x[None, :] @ w1 + b1[None, :]
    h = h * mask
    h = jnp.maximum(h, 0.0)
    logits = h @ w2.T + b2[None, :]
    probs = jax.nn.softmax(logits, axis=1)
    ref_action = jnp.where(u[0] < probs[0, 0], 0, 1).astype(jnp.int32)
    ref_logprob = jnp.log(probs[0, ref_action])

    assert action.shape == (1,) and logprob.shape == (1,)
    assert int(action[0]) == int(ref_action)
    assert jnp.allclose(logprob[0], ref_logprob, atol=1e-5, rtol=1e-5)

    print("KERNEL_OK")
</pallas_src>

<mosaic_0001>
module attributes {stable_mosaic.version = 11 : i64} {
  func.func @actor_kernel(%arg0: memref<4xf32, #tpu.memory_space<smem>>, %arg1: memref<1xf32, #tpu.memory_space<smem>>, %arg2: memref<4x128xf32, #tpu.memory_space<vmem>>, %arg3: memref<1x128xf32, #tpu.memory_space<vmem>>, %arg4: memref<1x128xf32, #tpu.memory_space<vmem>>, %arg5: memref<2x128xf32, #tpu.memory_space<vmem>>, %arg6: memref<2x1xf32, #tpu.memory_space<vmem>>, %arg7: memref<1xi32, #tpu.memory_space<smem>>, %arg8: memref<1xf32, #tpu.memory_space<smem>>) attributes {dimension_semantics = [], scalar_prefetch = 0 : i64, scratch_operands = 0 : i64, tpu.core_type = #tpu.core_type<tc>} {
    %c0 = arith.constant 0 : index
    %c0_0 = arith.constant 0 : index
    %0 = vector.load %arg3[%c0, %c0_0] : memref<1x128xf32, #tpu.memory_space<vmem>>, vector<1x128xf32>
    %c0_1 = arith.constant 0 : index
    %1 = memref.load %arg0[%c0_1] : memref<4xf32, #tpu.memory_space<smem>>
    %c0_2 = arith.constant 0 : index
    %c0_3 = arith.constant 0 : index
    %2 = vector.load %arg2[%c0_2, %c0_3] : memref<4x128xf32, #tpu.memory_space<vmem>>, vector<1x128xf32>
    %3 = vector.broadcast %1 : f32 to vector<1x128xf32>
    %4 = arith.mulf %3, %2 : vector<1x128xf32>
    %5 = arith.addf %0, %4 : vector<1x128xf32>
    %c1 = arith.constant 1 : index
    %6 = memref.load %arg0[%c1] : memref<4xf32, #tpu.memory_space<smem>>
    %c1_4 = arith.constant 1 : index
    %c0_5 = arith.constant 0 : index
    %7 = vector.load %arg2[%c1_4, %c0_5] : memref<4x128xf32, #tpu.memory_space<vmem>>, vector<1x128xf32>
    %8 = vector.broadcast %6 : f32 to vector<1x128xf32>
    %9 = arith.mulf %8, %7 : vector<1x128xf32>
    %10 = arith.addf %5, %9 : vector<1x128xf32>
    %c2 = arith.constant 2 : index
    %11 = memref.load %arg0[%c2] : memref<4xf32, #tpu.memory_space<smem>>
    %c2_6 = arith.constant 2 : index
    %c0_7 = arith.constant 0 : index
    %12 = vector.load %arg2[%c2_6, %c0_7] : memref<4x128xf32, #tpu.memory_space<vmem>>, vector<1x128xf32>
    %13 = vector.broadcast %11 : f32 to vector<1x128xf32>
    %14 = arith.mulf %13, %12 : vector<1x128xf32>
    %15 = arith.addf %10, %14 : vector<1x128xf32>
    %c3 = arith.constant 3 : index
    %16 = memref.load %arg0[%c3] : memref<4xf32, #tpu.memory_space<smem>>
    %c3_8 = arith.constant 3 : index
    %c0_9 = arith.constant 0 : index
    %17 = vector.load %arg2[%c3_8, %c0_9] : memref<4x128xf32, #tpu.memory_space<vmem>>, vector<1x128xf32>
    %18 = vector.broadcast %16 : f32 to vector<1x128xf32>
    %19 = arith.mulf %18, %17 : vector<1x128xf32>
    %20 = arith.addf %15, %19 : vector<1x128xf32>
    %c0_10 = arith.constant 0 : index
    %c0_11 = arith.constant 0 : index
    %21 = vector.load %arg4[%c0_10, %c0_11] : memref<1x128xf32, #tpu.memory_space<vmem>>, vector<1x128xf32>
    %22 = arith.mulf %20, %21 : vector<1x128xf32>
    %cst = arith.constant 0.000000e+00 : f32
    %23 = vector.broadcast %cst : f32 to vector<1x128xf32>
    %24 = arith.maximumf %22, %23 : vector<1x128xf32>
    %c0_12 = arith.constant 0 : index
    %c0_13 = arith.constant 0 : index
    %25 = vector.load %arg5[%c0_12, %c0_13] : memref<2x128xf32, #tpu.memory_space<vmem>>, vector<2x128xf32>
    %26 = vector.broadcast %24 : vector<1x128xf32> to vector<2x128xf32>
    %27 = arith.mulf %26, %25 : vector<2x128xf32>
    %cst_14 = arith.constant dense<0.000000e+00> : vector<2xf32>
    %28 = vector.multi_reduction <add>, %27, %cst_14 [1] : vector<2x128xf32> to vector<2xf32>
    %29 = vector.shape_cast %28 : vector<2xf32> to vector<2x1xf32>
    %c0_15 = arith.constant 0 : index
    %c0_16 = arith.constant 0 : index
    %30 = vector.load %arg6[%c0_15, %c0_16] : memref<2x1xf32, #tpu.memory_space<vmem>>, vector<2x1xf32>
    %31 = arith.addf %29, %30 : vector<2x1xf32>
    %cst_17 = arith.constant dense<0xFF800000> : vector<1xf32>
    %32 = vector.multi_reduction <maximumf>, %31, %cst_17 [0] : vector<2x1xf32> to vector<1xf32>
    %33 = vector.shape_cast %32 : vector<1xf32> to vector<1x1xf32>
    %34 = vector.broadcast %33 : vector<1x1xf32> to vector<2x1xf32>
    %35 = arith.subf %31, %34 : vector<2x1xf32>
    %36 = math.exp %35 : vector<2x1xf32>
    %cst_18 = arith.constant dense<0.000000e+00> : vector<1xf32>
    %37 = vector.multi_reduction <add>, %36, %cst_18 [0] : vector<2x1xf32> to vector<1xf32>
    %38 = vector.shape_cast %37 : vector<1xf32> to vector<1x1xf32>
    %39 = vector.broadcast %38 : vector<1x1xf32> to vector<2x1xf32>
    %40 = arith.divf %36, %39 : vector<2x1xf32>
    %41 = vector.broadcast %33 : vector<1x1xf32> to vector<2x1xf32>
    %42 = arith.subf %31, %41 : vector<2x1xf32>
    %43 = math.log %38 : vector<1x1xf32>
    %44 = vector.broadcast %43 : vector<1x1xf32> to vector<2x1xf32>
    %45 = arith.subf %42, %44 : vector<2x1xf32>
    %46 = tpu.iota {dimensions = array<i32: 0>} : vector<2x1xi32>
    %c0_i32 = arith.constant 0 : i32
    %47 = vector.broadcast %c0_i32 : i32 to vector<2x1xi32>
    %48 = arith.cmpi eq, %46, %47 : vector<2x1xi32>
    %49 = arith.extui %48 : vector<2x1xi1> to vector<2x1xi32>
    %50 = arith.sitofp %49 : vector<2x1xi32> to vector<2x1xf32>
    %51 = arith.mulf %40, %50 : vector<2x1xf32>
    %52 = vector.shape_cast %51 : vector<2x1xf32> to vector<1x2x1xf32>
    %cst_19 = arith.constant dense<0.000000e+00> : vector<1xf32>
    %53 = vector.multi_reduction <add>, %52, %cst_19 [1, 2] : vector<1x2x1xf32> to vector<1xf32>
    %54 = vector.shape_cast %53 : vector<1xf32> to vector<1x1x1xf32>
    %55 = vector.extract %54[0, 0, 0] : f32 from vector<1x1x1xf32>
    %56 = arith.mulf %45, %50 : vector<2x1xf32>
    %57 = vector.shape_cast %56 : vector<2x1xf32> to vector<1x2x1xf32>
    %cst_20 = arith.constant dense<0.000000e+00> : vector<1xf32>
    %58 = vector.multi_reduction <add>, %57, %cst_20 [1, 2] : vector<1x2x1xf32> to vector<1xf32>
    %59 = vector.shape_cast %58 : vector<1xf32> to vector<1x1x1xf32>
    %60 = vector.extract %59[0, 0, 0] : f32 from vector<1x1x1xf32>
    %cst_21 = arith.constant 1.000000e+00 : f32
    %61 = vector.broadcast %cst_21 : f32 to vector<2x1xf32>
    %62 = arith.subf %61, %50 : vector<2x1xf32>
    %63 = arith.mulf %45, %62 : vector<2x1xf32>
    %64 = vector.shape_cast %63 : vector<2x1xf32> to vector<1x2x1xf32>
    %cst_22 = arith.constant dense<0.000000e+00> : vector<1xf32>
    %65 = vector.multi_reduction <add>, %64, %cst_22 [1, 2] : vector<1x2x1xf32> to vector<1xf32>
    %66 = vector.shape_cast %65 : vector<1xf32> to vector<1x1x1xf32>
    %67 = vector.extract %66[0, 0, 0] : f32 from vector<1x1x1xf32>
    %c0_23 = arith.constant 0 : index
    %68 = memref.load %arg1[%c0_23] : memref<1xf32, #tpu.memory_space<smem>>
    %69 = arith.cmpf olt, %68, %55 : f32
    %c0_i32_24 = arith.constant 0 : i32
    %c1_i32 = arith.constant 1 : i32
    %70 = arith.select %69, %c0_i32_24, %c1_i32 : i32
    %c0_25 = arith.constant 0 : index
    %71 = memref.load %arg7[%c0_25] : memref<1xi32, #tpu.memory_space<smem>>
    memref.store %70, %arg7[%c0_25] : memref<1xi32, #tpu.memory_space<smem>>
    %72 = arith.select %69, %60, %67 : f32
    %c0_26 = arith.constant 0 : index
    %73 = memref.load %arg8[%c0_26] : memref<1xf32, #tpu.memory_space<smem>>
    memref.store %72, %arg8[%c0_26] : memref<1xf32, #tpu.memory_space<smem>>
    return
  }
}

</mosaic_0001>

<bundles_post_ra>
// kernel: tpu_custom_call.1
= control target key start
LH: loop header
LB: loop body
LE: loop exit
PB: predicated region body
PF: predicated region fallthrough
CT: control target
= control target key end

     0   :  { %15 = vsyncpa [#allocation5], 0  ;;  %s346_s0 = inlined_call_operand.vmem [shape: f32[4], index: 0, kind: input, shape index: {}]   ;;  %s347_s1 = inlined_call_operand.<no memory space> [shape: f32[1], index: 1, kind: input, shape index: {}]   ;;  %s348_s2 = inlined_call_operand.vmem [shape: f32[4,128], index: 2, kind: input, shape index: {}]   ;;  %s349_s3 = inlined_call_operand.vmem [shape: f32[1,128], index: 3, kind: input, shape index: {}]   ;;  %s350_s4 = inlined_call_operand.vmem [shape: f32[1,128], index: 4, kind: input, shape index: {}]   ;;  %s351_s5 = inlined_call_operand.vmem [shape: f32[2,128], index: 5, kind: input, shape index: {}]   ;;  %s352_s6 = inlined_call_operand.vmem [shape: f32[2,1], index: 6, kind: input, shape index: {}]   ;;  %s353_s7 = inlined_call_operand.hbm [shape: s32[1], index: 7, kind: output, shape index: {0}]   ;;  %s354_s8 = inlined_call_operand.hbm [shape: f32[1], index: 8, kind: output, shape index: {1}]  }
   0x1   :  { %16 = vsyncpa [#allocation4], 0 }
   0x2   :  { %17 = vsyncpa [#allocation8], 0  ;;  %s24_s29 = sshll.u32 %s346_s0, 4  ;;  %s25_s29 = int_to_ptr.vmem [resolvable:$true] %s24_s29 }
   0x3   :  { %s200_s30 = scalar_lea.vmem %s25_s29, 16  ;;  %p205_p1 = scmp.lt.s32.totalorder %s25_s29, %s25_s29 }
   0x4   :  { %p201_p0 = scmp.ne.s32.totalorder %s25_s29, %s200_s30  ;;  %p206_p2 = scmp.lt.s32.totalorder %s200_s30, %s200_s30 }
   0x6   :  { %p207_p3 = por %p206_p2, %p205_p1 }
   0x8   :  { %p208_p4 = pnand %p207_p3, %p201_p0 }
   0xa   :  { %211 = shalt.err (!%p208_p4)
}
   0xb   :  { %s238_s9 = smov [#allocation3]  }
   0xc   :  { %27 = dma.vmem_to_smem %s25_s29, 16, %s238_s9, [#allocation5]  }
   0xd   :  { %232 = dma.done.wait [#allocation5], 16  }
   0xe   :  { %233 = vsyncadd [#allocation5], 4294967280 }
   0xf   :  { %43 = sfence }
  0x10   :  { %s45_s10 = sld [smem:[#allocation3]]  ;;  %s179_s11 = sld [smem:[#allocation3 + $0x1]]  ;;  %v46_v0 = vld [vmem:[%s348_s2] sm:$0x1]  ;;  %v51_v1 = vld [vmem:[%s348_s2 + $0x1] sm:$0x1]  ;;  %v70_v13 = vlaneseq }
  0x11   :  { %s180_s12 = sld [smem:[#allocation3 + $0x2]]  ;;  %s181_s13 = sld [smem:[#allocation3 + $0x3]]  ;;  %v44_v2 = vld [vmem:[%s349_s3] sm:$0x1]  ;;  %v56_v4 = vld [vmem:[%s348_s2 + $0x2] sm:$0x1] }
  0x12   :  { %v61_v9 = vld [vmem:[%s348_s2 + $0x3] sm:$0x1]  ;;  %v71_v17 = vshrl.u32 %v70_v13, 7  ;;  %v65_v18 = vld [vmem:[%s350_s4] sm:$0x1]  ;;  %vm76_vm0 = vcmask 1041408  }
  0x13   :  { %v68_v23 = vld [vmem:[%s351_s5] sm:$0x3]  ;;  %vm82_vm1 = vcmask 1024   ;;  %v239_v48 = vmov 0.0  }
  0x14   :  { %v72_v21 = vsub.s32 0, %v71_v17  ;;  %v80_v27 = vld [vmem:[%s352_s6] sm:$0x3]  ;;  %vm107_vm2 = vcmp.eq.s32.totalorder %v71_v17, 0 }
  0x15   :  { %v182_v49 = vsel %vm107_vm2, 1.0, %v239_v48 }
  0x16   :  { %v47_v3 = vstv %s45_s10  ;;  %v52_v6 = vstv %s179_s11  ;;  %v132_v55 = vsub.f32 1.0, %v182_v49  ;;  %s212_s10 = scalar_lea.hbm %s353_s7, 16 }
  0x17   :  { %v48_v5 = vmul.f32 %v47_v3, %v46_v0  ;;  %v57_v7 = vstv %s180_s12  ;;  %v53_v8 = vmul.f32 %v52_v6, %v51_v1  ;;  %v62_v10 = vstv %s181_s13  ;;  %p213_p6 = scmp.ne.s32.totalorder %s353_s7, %s212_s10  ;;  %p216_p7 = scmp.lt.u32.totalorder %s212_s10, %s353_s7 }
  0x18   :  { %v58_v12 = vmul.f32 %v57_v7, %v56_v4  ;;  %v63_v15 = vmul.f32 %v62_v10, %v61_v9 }
  0x19   :  { %v49_v11 = vadd.f32 %v48_v5, %v44_v2  ;;  %p218_p8 = pnand %p216_p7, %p213_p6 }
  0x1b   :  { %v54_v14 = vadd.f32 %v53_v8, %v49_v11 }
  0x1d   :  { %v59_v16 = vadd.f32 %v58_v12, %v54_v14 }
  0x1f   :  { %v64_v19 = vadd.f32 %v63_v15, %v59_v16 }
  0x21   :  { %v66_v20 = vmul.f32 %v65_v18, %v64_v19 }
  0x23   :  { %v67_v22 = vmax.f32 %v66_v20, 0.0 }
  0x25   :  { %v73_v24 = vrot.slane %v67_v22, %v72_v21 }
  0x27   :  { %v75_v25 = vmul.f32 %v73_v24, %v68_v23 }
  0x29   :  { %v77_v26 = vsel %vm76_vm0, %v75_v25, 0.0 }
  0x2a   :  { %78 = vadd.xlane.f32.xlu0 %v77_v26 }
  0xb7   :  { %v79_v28 = vpop.xlane.xlu0 %78 }
  0xb8   :  { %v81_v29 = vadd.f32 %v80_v27, %v79_v28 }
  0xba   :  { %v83_v30 = vsel %vm82_vm1, %v81_v29, -inf }
  0xbb   :  { %v84_v31 = vrot.slane %v83_v30, 4 }
  0xbd   :  { %v85_v32 = vmax.f32 %v83_v30, %v84_v31 }
  0xbf   :  { %v86_v33 = vrot.slane %v85_v32, 2 }
  0xc1   :  { %v87_v34 = vmax.f32 %v85_v32, %v86_v33 }
  0xc3   :  { %v88_v35 = vrot.slane %v87_v34, 1 }
  0xc5   :  { %v89_v36 = vmax.f32 %v87_v34, %v88_v35 }
  0xc7   :  { %v90_v37 = vsub.f32 %v81_v29, %v89_v36 }
  0xc9   :  { %v91_v38 = vmul.f32 1.442695, %v90_v37 }
  0xcb   :  { %194 = vpow2.f32 %v91_v38 }
  0xd5   :  { %v195_v39 = vpop.eup %194 }
  0xd6   :  { %v93_v40 = vsel %vm82_vm1, %v195_v39, 0.0 }
  0xd7   :  { %v94_v41 = vrot.slane %v93_v40, 4 }
  0xd9   :  { %v95_v42 = vadd.f32 %v94_v41, %v93_v40 }
  0xdb   :  { %v96_v43 = vrot.slane %v95_v42, 2 }
  0xdd   :  { %v97_v44 = vadd.f32 %v96_v43, %v95_v42 }
  0xdf   :  { %v98_v45 = vrot.slane %v97_v44, 1 }
  0xe1   :  { %v99_v46 = vadd.f32 %v98_v45, %v97_v44 }
  0xe3   :  { %196 = vrcp.f32 %v99_v46 }
  0xe4   :  { %198 = vlog2.f32 %v99_v46 }
  0xed   :  { %v197_v47 = vpop.eup %196 }
  0xee   :  { %v199_v50 = vpop.eup %198  ;;  %v101_v51 = vmul.f32 %v197_v47, %v195_v39 }
  0xef   :  { %v103_v52 = vmul.f32 0.6931472, %v199_v50 }
  0xf0   :  { %v110_v53 = vmul.f32 %v182_v49, %v101_v51 }
  0xf1   :  { %v104_v54 = vsub.f32 %v90_v37, %v103_v52 }
  0xf2   :  { %v111_v56 = vsel %vm82_vm1, %v110_v53, 0.0 }
  0xf3   :  { %112 = vadd.xlane.f32.xlu0 %v111_v56  ;;  %v121_v57 = vmul.f32 %v182_v49, %v104_v54  ;;  %v133_v59 = vmul.f32 %v132_v55, %v104_v54 }
  0xf5   :  { %v122_v58 = vsel %vm82_vm1, %v121_v57, 0.0  ;;  %v134_v60 = vsel %vm82_vm1, %v133_v59, 0.0 }
  0xf6   :  { %123 = vadd.xlane.f32.xlu1 %v122_v58 }
  0xfa   :  { %135 = vadd.xlane.f32.xlu1 %v134_v60 }
 0x180   :  { %v113_v61 = vpop.xlane.xlu0 %112 }
 0x181   :  { %v114_v62 = vrot.slane %v113_v61, 4 }
 0x183   :  { %v115_v63 = vadd.f32 %v114_v62, %v113_v61  ;;  %v124_v0 = vpop.xlane.xlu1 %123 }
 0x184   :  { %v125_v1 = vrot.slane %v124_v0, 4 }
 0x185   :  { %v116_v2 = vrot.slane %v115_v63, 2 }
 0x186   :  { %v126_v3 = vadd.f32 %v125_v1, %v124_v0 }
 0x187   :  { %v136_v4 = vpop.xlane.xlu1 %135  ;;  %v117_v5 = vadd.f32 %v116_v2, %v115_v63 }
 0x188   :  { %v127_v6 = vrot.slane %v126_v3, 2  ;;  %v137_v7 = vrot.slane %v136_v4, 4 }
 0x189   :  { %v118_v8 = vrot.slane %v117_v5, 1 }
 0x18a   :  { %v138_v9 = vadd.f32 %v137_v7, %v136_v4  ;;  %v128_v10 = vadd.f32 %v127_v6, %v126_v3 }
 0x18b   :  { %v119_v11 = vadd.f32 %v118_v8, %v117_v5 }
 0x18c   :  { %v139_v12 = vrot.slane %v138_v9, 2  ;;  %v129_v13 = vrot.slane %v128_v10, 1 }
 0x18d   :  { %184 = vpush %v119_v11 }
 0x18e   :  { %v140_v14 = vadd.f32 %v139_v12, %v138_v9  ;;  %v130_v15 = vadd.f32 %v129_v13, %v128_v10 }
 0x190   :  { %186 = vpush %v130_v15  ;;  %v141_v16 = vrot.slane %v140_v14, 1 }
 0x192   :  { %v142_v17 = vadd.f32 %v141_v16, %v140_v14 }
 0x194   :  { %188 = vpush %v142_v17 }
 0x1be   :  { %s185_s4 = spop %184 }
 0x1bf   :  { %p145_p5 = scmp.lt.f32.partialorder %s347_s1, %s185_s4 }
 0x1c1   :  { %s183_s27 = scalar_select %p145_p5, 0, 1 }
 0x1c2   :  { %s187_s28 = spop %186 }
 0x1c3   :  { %149 = sst [smem:[#allocation6]] %s183_s27 }
 0x1c5   :  { %s189_s29 = spop %188 }
 0x1c6   :  { %221 = shalt.err (!%p218_p8)
}
 0x1c7   :  { %s240_s15 = smov [#allocation6]   ;;  %s356_s28 = smov (!%p145_p5, %s187_s28), %s189_s29 }
 0x1c8   :  { %160 = dma.smem_to_hbm %s240_s15, 16, %s353_s7, [#allocation4]  }
 0x1c9   :  { %152 = sst [smem:[#allocation7]] %s356_s28  ;;  %s222_s18 = scalar_lea.hbm %s354_s8, 16 }
 0x1ca   :  { %p223_p9 = scmp.ne.s32.totalorder %s354_s8, %s222_s18  ;;  %p226_p10 = scmp.lt.u32.totalorder %s222_s18, %s354_s8 }
 0x1cc   :  { %p228_p11 = pnand %p226_p10, %p223_p9 }
 0x1ce   :  { %231 = shalt.err (!%p228_p11)
}
 0x1cf   :  { %s241_s3 = smov [#allocation7]  }
 0x1d0   :  { %168 = dma.smem_to_hbm %s241_s3, 16, %s354_s8, [#allocation8]  }
 0x1d1   :  { %234 = dma.done.wait [#allocation4], 16  }
 0x1d2   :  { %235 = vsyncadd [#allocation4], 4294967280 }
 0x1d3   :  { %236 = dma.done.wait [#allocation8], 16  }
 0x1d4   :  { %237 = vsyncadd [#allocation8], 4294967280 }
 0x1d5   :  { %175 = sfence }
 0x1d6   :  { %176 = vsyncpa [#allocation4], 1 }
 0x1d7   :  { %177 = vsyncpa [#allocation8], 1 }
 0x1d8   :  { %178 = vsyncpa [#allocation5], 1 }

</bundles_post_ra>
